<compile_context>
chip_gen: v7x
topology: tpu7x:2x2x1
jax: 0.10.0
libtpu: 0.0.40
codegen_flags: <defaults>
</compile_context>

<pallas_src>
import jax
import jax.numpy as jnp
from jax.experimental import pallas as pl
from jax.experimental.pallas import tpu as pltpu


def _elman_kernel(x_ref, h_ref, wh_ref, uh_ref, b_ref, o_ref, acc_ref):
    """One (n, k) tile of out = tanh(x @ Wh + h @ Uh + b).

    grid = (num_n, num_k): axis 0 tiles the output dim ("parallel"),
    axis 1 walks the contraction dim ("arbitrary", innermost).  The f32
    accumulator is seeded with the broadcast bias on the first K step, so the
    last-step epilogue is just tanh + cast.
    """
    k = pl.program_id(1)

    @pl.when(k == 0)
    def _():
        acc_ref[...] = jnp.broadcast_to(
            b_ref[...].astype(jnp.float32), acc_ref.shape
        )

    # Two MXU matmuls, f32 accumulation (bf16 operands by default).
    acc_ref[...] += jnp.dot(
        x_ref[...], wh_ref[...], preferred_element_type=jnp.float32
    ) + jnp.dot(
        h_ref[...], uh_ref[...], preferred_element_type=jnp.float32
    )

    @pl.when(k == pl.num_programs(1) - 1)
    def _():
        o_ref[...] = jnp.tanh(acc_ref[...]).astype(o_ref.dtype)


def _vmem_capacity_bytes():
    """Best-effort physical VMEM query; conservative (v7x) default."""
    try:
        info = pltpu.get_tpu_info()
        cap = getattr(info, "vmem_capacity_bytes", None)
        if cap:
            return int(cap)
    except Exception:
        pass
    return 64 << 20


def _pick_tiles(D, itemsize, vmem_cap):
    """Choose (tn, tk, vmem_limit_bytes) for the (D-out, D-contract) tiling."""
    if vmem_cap >= (128 << 20):
        # v5e / v6e: 128 MiB physical VMEM -> big tiles, fewer grid steps.
        weight_budget = 24 << 20
        vmem_limit = 96 << 20
    else:
        # v7x: 64 MiB physical per TC -> leave headroom.
        weight_budget = 8 << 20
        vmem_limit = 48 << 20

    if D % 128 != 0:
        # Full-extent blocks are always a legal block shape (small-D fallback).
        return D, D, vmem_limit

    # Output (lane) tile: multiple of 128; 256+ helps fill the 256-wide MXU
    # columns on v6e/v7x.  Never larger than D.
    tn = 128
    for cand in (512, 256, 128):
        if D % cand == 0:
            tn = cand
            break

    # Contraction tile: multiple of 128 dividing D, with both double-buffered
    # weight tiles (Wh + Uh) inside the budget.  Fallback is tk=128, NOT tk=D.
    tk = 128
    for cand in (2048, 1024, 512, 256, 128):
        if D % cand == 0 and 2 * 2 * cand * tn * itemsize <= weight_budget:
            tk = cand
            break
    return tn, tk, vmem_limit


def elman_rnn_unit(x, h, Wh, Uh, b, *, compute_dtype=jnp.bfloat16):
    """tanh(x @ Wh + h @ Uh + b) as a single Pallas call (no wrapper concats)."""
    B, D = x.shape
    out_dtype = x.dtype
    itemsize = jnp.dtype(compute_dtype).itemsize

    xc = x.astype(compute_dtype)
    hc = h.astype(compute_dtype)
    Whc = Wh.astype(compute_dtype)
    Uhc = Uh.astype(compute_dtype)
    b2d = b.reshape(1, D).astype(jnp.float32)

    tn, tk, vmem_limit = _pick_tiles(D, itemsize, _vmem_capacity_bytes())
    num_n = D // tn
    num_k = D // tk

    cost = pl.CostEstimate(
        flops=4 * B * D * D,                # two B x D x D matmuls
        transcendentals=B * D,              # tanh
        bytes_accessed=(
            2 * B * D * itemsize            # x, h
            + 2 * D * D * itemsize          # Wh, Uh
            + D * 4                         # bias
            + B * D * jnp.dtype(out_dtype).itemsize
        ),
    )

    grid_spec = pltpu.PrefetchScalarGridSpec(
        num_scalar_prefetch=0,
        grid=(num_n, num_k),                # N parallel, K (reduction) last
        in_specs=[
            pl.BlockSpec((B, tk), lambda n, k: (0, k)),    # x
            pl.BlockSpec((B, tk), lambda n, k: (0, k)),    # h
            pl.BlockSpec((tk, tn), lambda n, k: (k, n)),   # Wh
            pl.BlockSpec((tk, tn), lambda n, k: (k, n)),   # Uh
            pl.BlockSpec((1, tn), lambda n, k: (0, n)),    # bias
        ],
        out_specs=pl.BlockSpec((B, tn), lambda n, k: (0, n)),  # resident per n
        scratch_shapes=[pltpu.VMEM((B, tn), jnp.float32)],     # f32 accumulator
    )

    return pl.pallas_call(
        _elman_kernel,
        out_shape=jax.ShapeDtypeStruct((B, D), out_dtype),
        grid_spec=grid_spec,
        compiler_params=pltpu.CompilerParams(
            dimension_semantics=("parallel", "arbitrary"),
            vmem_limit_bytes=vmem_limit,
        ),
        cost_estimate=cost,
    )(xc, hc, Whc, Uhc, b2d)


if __name__ == "__main__":
    batch = 8
    embedding_dim = 128  # lane-aligned (vreg lane dim = 128)

    key = jax.random.PRNGKey(0)
    kx, kh, kwh, kuh = jax.random.split(key, 4)

    x = jax.random.normal(kx, (batch, embedding_dim), dtype=jnp.float32)
    h = jax.random.normal(kh, (batch, embedding_dim), dtype=jnp.float32)
    # Mirrors torch.randn / torch.zeros parameter shapes.
    Wh = jax.random.normal(kwh, (embedding_dim, embedding_dim), dtype=jnp.float32)
    Uh = jax.random.normal(kuh, (embedding_dim, embedding_dim), dtype=jnp.float32)
    b = jnp.zeros((embedding_dim,), dtype=jnp.float32)

    # Optimized path: bf16 MXU operands, f32 accumulation.
    out_bf16 = jax.block_until_ready(elman_rnn_unit(x, h, Wh, Uh, b))

    # Exact-math path (f32 operands) for a tight semantic check.
    out_f32 = jax.block_until_ready(
        elman_rnn_unit(x, h, Wh, Uh, b, compute_dtype=jnp.float32)
    )

    # References.
    ref_f32 = jnp.tanh(x @ Wh + h @ Uh + b)
    ref_bf16 = jnp.tanh(
        jnp.dot(x.astype(jnp.bfloat16), Wh.astype(jnp.bfloat16),
                preferred_element_type=jnp.float32)
        + jnp.dot(h.astype(jnp.bfloat16), Uh.astype(jnp.bfloat16),
                  preferred_element_type=jnp.float32)
        + b
    )

    assert out_bf16.shape == (batch, embedding_dim)
    assert out_f32.shape == (batch, embedding_dim)
    # f32 kernel path vs. plain-JAX f32 reference.
    assert jnp.allclose(out_f32, ref_f32, atol=1e-3, rtol=1e-3)
    # bf16-operand path vs. matched-precision reference (bf16 in, f32 acc).
    # NOTE: tolerance is calibrated for this small K; bf16 error grows ~sqrt(K).
    assert jnp.allclose(out_bf16, ref_bf16, atol=2e-2, rtol=2e-2)

    print("KERNEL_OK")
</pallas_src>

<mosaic_0001>
module attributes {stable_mosaic.version = 11 : i64} {
  func.func @_elman_kernel(%arg0: i32, %arg1: i32, %arg2: memref<8x128xbf16, #tpu.memory_space<vmem>>, %arg3: memref<8x128xbf16, #tpu.memory_space<vmem>>, %arg4: memref<128x128xbf16, #tpu.memory_space<vmem>>, %arg5: memref<128x128xbf16, #tpu.memory_space<vmem>>, %arg6: memref<1x128xf32, #tpu.memory_space<vmem>>, %arg7: memref<8x128xf32, #tpu.memory_space<vmem>>, %arg8: memref<8x128xf32, #tpu.memory_space<vmem>>) attributes {dimension_semantics = [#tpu.dimension_semantics<parallel>, #tpu.dimension_semantics<arbitrary>], iteration_bounds = array<i64: 1, 1>, scalar_prefetch = 0 : i64, scratch_operands = 1 : i64, tpu.core_type = #tpu.core_type<tc>, window_params = [{transform_indices = @transform_0, window_bounds = array<i64: 8, 128>}, {transform_indices = @transform_1, window_bounds = array<i64: 8, 128>}, {transform_indices = @transform_2, window_bounds = array<i64: 128, 128>}, {transform_indices = @transform_3, window_bounds = array<i64: 128, 128>}, {transform_indices = @transform_4, window_bounds = array<i64: 1, 128>}, {transform_indices = @transform_5, window_bounds = array<i64: 8, 128>}]} {
    %c0_i32 = arith.constant 0 : i32
    %0 = arith.cmpi eq, %arg1, %c0_i32 : i32
    %1 = arith.extui %0 : i1 to i32
    %c0_i32_0 = arith.constant 0 : i32
    %2 = arith.cmpi ne, %1, %c0_i32_0 : i32
    scf.if %2 {
      %c0_15 = arith.constant 0 : index
      %c0_16 = arith.constant 0 : index
      %16 = vector.load %arg6[%c0_15, %c0_16] : memref<1x128xf32, #tpu.memory_space<vmem>>, vector<1x128xf32>
      %17 = vector.shape_cast %16 : vector<1x128xf32> to vector<1x128xf32>
      %18 = vector.broadcast %17 : vector<1x128xf32> to vector<8x128xf32>
      %c0_17 = arith.constant 0 : index
      %c0_18 = arith.constant 0 : index
      %19 = vector.load %arg8[%c0_17, %c0_18] : memref<8x128xf32, #tpu.memory_space<vmem>>, vector<8x128xf32>
      tpu.vector_store %arg8[%c0_17, %c0_18], %18 {strides = array<i32>} : memref<8x128xf32, #tpu.memory_space<vmem>>, vector<8x128xf32>,
    } else {
    }
    %c0 = arith.constant 0 : index
    %c0_1 = arith.constant 0 : index
    %3 = vector.load %arg8[%c0, %c0_1] : memref<8x128xf32, #tpu.memory_space<vmem>>, vector<8x128xf32>
    %c0_2 = arith.constant 0 : index
    %c0_3 = arith.constant 0 : index
    %4 = vector.load %arg2[%c0_2, %c0_3] : memref<8x128xbf16, #tpu.memory_space<vmem>>, vector<8x128xbf16>
    %c0_4 = arith.constant 0 : index
    %c0_5 = arith.constant 0 : index
    %5 = vector.load %arg4[%c0_4, %c0_5] : memref<128x128xbf16, #tpu.memory_space<vmem>>, vector<128x128xbf16>
    %cst = arith.constant dense<0.000000e+00> : vector<8x128xf32>
    %6 = tpu.matmul %4, %5, %cst {dimension_numbers = #tpu.dot_dimension_numbers<[1], [0], [0], [1], [0, 0, 1, 1], [], []>} : vector<8x128xbf16>, vector<128x128xbf16>, vector<8x128xf32> -> vector<8x128xf32>
    %c0_6 = arith.constant 0 : index
    %c0_7 = arith.constant 0 : index
    %7 = vector.load %arg3[%c0_6, %c0_7] : memref<8x128xbf16, #tpu.memory_space<vmem>>, vector<8x128xbf16>
    %c0_8 = arith.constant 0 : index
    %c0_9 = arith.constant 0 : index
    %8 = vector.load %arg5[%c0_8, %c0_9] : memref<128x128xbf16, #tpu.memory_space<vmem>>, vector<128x128xbf16>
    %cst_10 = arith.constant dense<0.000000e+00> : vector<8x128xf32>
    %9 = tpu.matmul %7, %8, %cst_10 {dimension_numbers = #tpu.dot_dimension_numbers<[1], [0], [0], [1], [0, 0, 1, 1], [], []>} : vector<8x128xbf16>, vector<128x128xbf16>, vector<8x128xf32> -> vector<8x128xf32>
    %10 = arith.addf %6, %9 : vector<8x128xf32>
    %11 = arith.addf %3, %10 : vector<8x128xf32>
    %c0_11 = arith.constant 0 : index
    %c0_12 = arith.constant 0 : index
    %12 = vector.load %arg8[%c0_11, %c0_12] : memref<8x128xf32, #tpu.memory_space<vmem>>, vector<8x128xf32>
    tpu.vector_store %arg8[%c0_11, %c0_12], %11 {strides = array<i32>} : memref<8x128xf32, #tpu.memory_space<vmem>>, vector<8x128xf32>,
    %c0_i32_13 = arith.constant 0 : i32
    %13 = arith.cmpi eq, %arg1, %c0_i32_13 : i32
    %14 = arith.extui %13 : i1 to i32
    %c0_i32_14 = arith.constant 0 : i32
    %15 = arith.cmpi ne, %14, %c0_i32_14 : i32
    scf.if %15 {
      %c0_15 = arith.constant 0 : index
      %c0_16 = arith.constant 0 : index
      %16 = vector.load %arg8[%c0_15, %c0_16] : memref<8x128xf32, #tpu.memory_space<vmem>>, vector<8x128xf32>
      %17 = math.tanh %16 : vector<8x128xf32>
      %c0_17 = arith.constant 0 : index
      %c0_18 = arith.constant 0 : index
      %18 = vector.load %arg7[%c0_17, %c0_18] : memref<8x128xf32, #tpu.memory_space<vmem>>, vector<8x128xf32>
      tpu.vector_store %arg7[%c0_17, %c0_18], %17 {strides = array<i32>} : memref<8x128xf32, #tpu.memory_space<vmem>>, vector<8x128xf32>,
    } else {
    }
    return
  }
  func.func @transform_0(%arg0: i32, %arg1: i32) -> (i32, i32) {
    %c0_i32 = arith.constant 0 : i32
    %c0_i32_0 = arith.constant 0 : i32
    return %c0_i32, %arg1 : i32, i32
  }
  func.func @transform_1(%arg0: i32, %arg1: i32) -> (i32, i32) {
    %c0_i32 = arith.constant 0 : i32
    %c0_i32_0 = arith.constant 0 : i32
    return %c0_i32, %arg1 : i32, i32
  }
  func.func @transform_2(%arg0: i32, %arg1: i32) -> (i32, i32) {
    %c0_i32 = arith.constant 0 : i32
    return %arg1, %arg0 : i32, i32
  }
  func.func @transform_3(%arg0: i32, %arg1: i32) -> (i32, i32) {
    %c0_i32 = arith.constant 0 : i32
    return %arg1, %arg0 : i32, i32
  }
  func.func @transform_4(%arg0: i32, %arg1: i32) -> (i32, i32) {
    %c0_i32 = arith.constant 0 : i32
    %c0_i32_0 = arith.constant 0 : i32
    return %c0_i32, %arg0 : i32, i32
  }
  func.func @transform_5(%arg0: i32, %arg1: i32) -> (i32, i32) {
    %c0_i32 = arith.constant 0 : i32
    %c0_i32_0 = arith.constant 0 : i32
    return %c0_i32, %arg0 : i32, i32
  }
}

</mosaic_0001>

<bundles_post_ra>
// kernel: tpu_custom_call.1
= control target key start
LH: loop header
LB: loop body
LE: loop exit
PB: predicated region body
PF: predicated region fallthrough
CT: control target
= control target key end

     0   :  { %10 = vsyncpa [#allocation4], 0  ;;  %s643_s0 = inlined_call_operand.hbm [shape: bf16[8,128], index: 0, kind: input, shape index: {}]   ;;  %s644_s1 = inlined_call_operand.hbm [shape: bf16[8,128], index: 1, kind: input, shape index: {}]   ;;  %s645_s2 = inlined_call_operand.hbm [shape: bf16[128,128], index: 2, kind: input, shape index: {}]   ;;  %s646_s3 = inlined_call_operand.hbm [shape: bf16[128,128], index: 3, kind: input, shape index: {}]   ;;  %s647_s4 = inlined_call_operand.vmem [shape: f32[1,128], index: 4, kind: input, shape index: {}]   ;;  %s648_s5 = inlined_call_operand.hbm [shape: f32[8,128], index: 5, kind: output, shape index: {}]  }
   0x1   :  { %11 = vsyncpa [#allocation7], 0 }
   0x2   :  { %12 = vsyncpa [#allocation10], 0 }
   0x3   :  { %13 = vsyncpa [#allocation5], 0  ;;  %s541_s18 = smov [#allocation6]   ;;  %s542_s20 = smov [#allocation3]  }
   0x4   :  { %s30_s19 = sshll.u32 %s541_s18, 4  ;;  %s20_s21 = sshll.u32 %s542_s20, 4  ;;  %s31_s19 = int_to_ptr.vmem [resolvable:$true] %s30_s19  ;;  %s21_s21 = int_to_ptr.vmem [resolvable:$true] %s20_s21 }
   0x5   :  { %s423_s24 = scalar_lea.hbm %s644_s1, 64 }
   0x6   :  { %p424_p0 = scmp.ne.s32.totalorder %s644_s1, %s423_s24  ;;  %p427_p1 = scmp.lt.u32.totalorder %s423_s24, %s644_s1 }
   0x8   :  { %p429_p2 = pnand %p427_p1, %p424_p0 }
   0xa   :  { %432 = shalt.err (!%p429_p2)
}
   0xb   :  { %s433_s29 = scalar_lea.vmem %s31_s19, 64  ;;  %p438_p4 = scmp.lt.s32.totalorder %s31_s19, %s31_s19 }
   0xc   :  { %p434_p3 = scmp.ne.s32.totalorder %s31_s19, %s433_s29  ;;  %p439_p5 = scmp.lt.s32.totalorder %s433_s29, %s433_s29 }
   0xe   :  { %p440_p6 = por %p439_p5, %p438_p4 }
  0x10   :  { %p441_p7 = pnand %p440_p6, %p434_p3 }
  0x12   :  { %444 = shalt.err (!%p441_p7)
}
  0x13   :  { %33 = dma.hbm_to_vmem [thread:$0]  %s644_s1, 64, %s31_s19, [#allocation7]  }
  0x14   :  { %s445_s9 = scalar_lea.hbm %s643_s0, 64 }
  0x15   :  { %p446_p8 = scmp.ne.s32.totalorder %s643_s0, %s445_s9  ;;  %p449_p9 = scmp.lt.u32.totalorder %s445_s9, %s643_s0 }
  0x17   :  { %p451_p10 = pnand %p449_p9, %p446_p8 }
  0x19   :  { %454 = shalt.err (!%p451_p10)
}
  0x1a   :  { %s455_s14 = scalar_lea.vmem %s21_s21, 64  ;;  %p460_p12 = scmp.lt.s32.totalorder %s21_s21, %s21_s21 }
  0x1b   :  { %p456_p11 = scmp.ne.s32.totalorder %s21_s21, %s455_s14  ;;  %p461_p13 = scmp.lt.s32.totalorder %s455_s14, %s455_s14 }
  0x1d   :  { %p462_p0 = por %p461_p13, %p460_p12 }
  0x1f   :  { %p463_p1 = pnand %p462_p0, %p456_p11 }
  0x21   :  { %466 = shalt.err (!%p463_p1)
}
  0x22   :  { %23 = dma.hbm_to_vmem [thread:$0]  %s643_s0, 64, %s21_s21, [#allocation4]  }
  0x23   :  { %s543_s16 = smov [#allocation8]   ;;  %s467_s20 = scalar_lea.hbm %s645_s2, 1024 }
  0x24   :  { %s39_s17 = sshll.u32 %s543_s16, 4  ;;  %p468_p2 = scmp.ne.s32.totalorder %s645_s2, %s467_s20  ;;  %s40_s17 = int_to_ptr.vmem [resolvable:$true] %s39_s17 }
  0x25   :  { %p471_p3 = scmp.lt.u32.totalorder %s467_s20, %s645_s2 }
  0x27   :  { %p473_p4 = pnand %p471_p3, %p468_p2 }
  0x29   :  { %476 = shalt.err (!%p473_p4)
}
  0x2a   :  { %s477_s26 = scalar_lea.vmem %s40_s17, 1024  ;;  %p482_p6 = scmp.lt.s32.totalorder %s40_s17, %s40_s17 }
  0x2b   :  { %p478_p5 = scmp.ne.s32.totalorder %s40_s17, %s477_s26  ;;  %p483_p7 = scmp.lt.s32.totalorder %s477_s26, %s477_s26 }
  0x2d   :  { %p484_p8 = por %p483_p7, %p482_p6 }
  0x2f   :  { %p485_p9 = pnand %p484_p8, %p478_p5 }
  0x31   :  { %488 = shalt.err (!%p485_p9)
}
  0x32   :  { %s544_s0 = smov 64   ;;  %s545_s21 = smov 4  }
  0x33   :  { %45 = dma.hbm_to_vmem [thread:$0]  %s645_s2, 1024, %s40_s17, [#allocation7], %s544_s0, %s544_s0, %s545_s21  }
  0x34   :  { %s546_s29 = smov [#allocation9]   ;;  %s489_s8 = scalar_lea.hbm %s646_s3, 1024 }
  0x35   :  { %s51_s30 = sshll.u32 %s546_s29, 4  ;;  %p490_p10 = scmp.ne.s32.totalorder %s646_s3, %s489_s8  ;;  %s52_s30 = int_to_ptr.vmem [resolvable:$true] %s51_s30 }
  0x36   :  { %p493_p11 = scmp.lt.u32.totalorder %s489_s8, %s646_s3 }
  0x38   :  { %p495_p12 = pnand %p493_p11, %p490_p10 }
  0x3a   :  { %498 = shalt.err (!%p495_p12)
}
  0x3b   :  { %s499_s13 = scalar_lea.vmem %s52_s30, 1024  ;;  %p504_p0 = scmp.lt.s32.totalorder %s52_s30, %s52_s30 }
  0x3c   :  { %p500_p13 = scmp.ne.s32.totalorder %s52_s30, %s499_s13  ;;  %p505_p1 = scmp.lt.s32.totalorder %s499_s13, %s499_s13 }
  0x3e   :  { %p506_p2 = por %p505_p1, %p504_p0 }
  0x40   :  { %p507_p3 = pnand %p506_p2, %p500_p13 }
  0x42   :  { %510 = shalt.err (!%p507_p3)
}
  0x43   :  { %57 = dma.hbm_to_vmem [thread:$0]  %s646_s3, 1024, %s52_s30, [#allocation10], %s544_s0, %s544_s0, %s545_s21  }
  0x44   :  { %533 = dma.done.wait [#allocation4], 64  }
  0x45   :  { %534 = vsyncadd [#allocation4], 4294967232 }
  0x46   :  { %535 = dma.done.wait [#allocation7], 1088  }
  0x47   :  { %536 = vsyncadd [#allocation7], 4294966208 }
  0x48   :  { %537 = dma.done.wait [#allocation10], 1024  }
  0x49   :  { %538 = vsyncadd [#allocation10], 4294966272  ;;  %v547_v0 = vmov 0.0   ;;  %vm548_vm0 = vmmov 0   ;;  %v405_v1 = vld [vmem:[#allocation9] sm:$0xff]   ;;  %v407_v3 = vld [vmem:[#allocation9 + $0x8] sm:$0xff]  }
  0x4a   :  { %356 = vmatprep.subr.bf16.mxu0 %v547_v0  ;;  %376 = vmatprep.subr.bf16.mxu1 %v547_v0  ;;  %v406_v2 = vld [vmem:[#allocation8] sm:$0xff]   ;;  %v408_v4 = vld [vmem:[#allocation8 + $0x8] sm:$0xff]   ;;  %v409_v5 = vld [vmem:[#allocation9 + $0x10] sm:$0xff]   ;;  %s549_s15 = smov [#allocation11]  }
  0x4b   :  { %372 = vmatprep.mubr.msk.bf16.mxu0 %vm548_vm0, %v547_v0  ;;  %392 = vmatprep.mubr.msk.bf16.mxu1 %vm548_vm0, %v547_v0  ;;  %v410_v6 = vld [vmem:[#allocation8 + $0x10] sm:$0xff]   ;;  %v411_v7 = vld [vmem:[#allocation9 + $0x18] sm:$0xff]   ;;  %v413_v9 = vld [vmem:[#allocation9 + $0x20] sm:$0xff]   ;;  %s310_s16 = sshll.u32 %s549_s15, 4  ;;  %s311_s16 = int_to_ptr.vmem [resolvable:$true] %s310_s16 }
  0x4c   :  { %357 = vmatpush3.bf16.msra.mxu0 %v405_v1  ;;  %377 = vmatpush3.bf16.msra.mxu1 %v406_v2  ;;  %v412_v8 = vld [vmem:[#allocation8 + $0x18] sm:$0xff]   ;;  %v414_v10 = vld [vmem:[#allocation8 + $0x20] sm:$0xff]   ;;  %v415_v11 = vld [vmem:[#allocation9 + $0x28] sm:$0xff]   ;;  %s511_s17 = scalar_lea.vmem %s311_s16, 128  ;;  %p516_p5 = scmp.lt.s32.totalorder %s311_s16, %s311_s16 }
  0x4d   :  { %358 = vmatprep.subr.bf16.mxu0 %v547_v0  ;;  %378 = vmatprep.subr.bf16.mxu1 %v547_v0  ;;  %v416_v12 = vld [vmem:[#allocation8 + $0x28] sm:$0xff]   ;;  %v417_v13 = vld [vmem:[#allocation9 + $0x30] sm:$0xff]   ;;  %v419_v15 = vld [vmem:[#allocation9 + $0x38] sm:$0xff]   ;;  %p512_p4 = scmp.ne.s32.totalorder %s311_s16, %s511_s17  ;;  %p517_p6 = scmp.lt.s32.totalorder %s511_s17, %s511_s17 }
  0x4e   :  { %v418_v14 = vld [vmem:[#allocation8 + $0x30] sm:$0xff]   ;;  %v420_v16 = vld [vmem:[#allocation8 + $0x38] sm:$0xff]  }
  0x4f   :  { %v103_v17 = vld [vmem:[#allocation6] sm:$0xf]  ;;  %v86_v18 = vld [vmem:[#allocation3] sm:$0xf]  ;;  %p518_p7 = por %p517_p6, %p516_p5 }
  0x50   :  { %359 = vmatpush3.bf16.msra.mxu0 %v407_v3  ;;  %379 = vmatpush3.bf16.msra.mxu1 %v408_v4  ;;  %v321_v20 = vld [vmem:[%s647_s4] ss:$0 sm:$0xff] }
  0x51   :  { %360 = vmatprep.subr.bf16.mxu0 %v547_v0  ;;  %380 = vmatprep.subr.bf16.mxu1 %v547_v0  ;;  %p519_p8 = pnand %p518_p7, %p512_p4 }
  0x54   :  { %361 = vmatpush3.bf16.msra.mxu0 %v409_v5  ;;  %381 = vmatpush3.bf16.msra.mxu1 %v410_v6 }
  0x55   :  { %362 = vmatprep.subr.bf16.mxu0 %v547_v0  ;;  %382 = vmatprep.subr.bf16.mxu1 %v547_v0 }
  0x58   :  { %363 = vmatpush3.bf16.msra.mxu0 %v411_v7  ;;  %383 = vmatpush3.bf16.msra.mxu1 %v412_v8 }
  0x59   :  { %364 = vmatprep.subr.bf16.mxu0 %v547_v0  ;;  %384 = vmatprep.subr.bf16.mxu1 %v547_v0 }
  0x5c   :  { %365 = vmatpush3.bf16.msra.mxu0 %v413_v9  ;;  %385 = vmatpush3.bf16.msra.mxu1 %v414_v10 }
  0x5d   :  { %366 = vmatprep.subr.bf16.mxu0 %v547_v0  ;;  %386 = vmatprep.subr.bf16.mxu1 %v547_v0 }
  0x60   :  { %367 = vmatpush3.bf16.msra.mxu0 %v415_v11  ;;  %387 = vmatpush3.bf16.msra.mxu1 %v416_v12 }
  0x61   :  { %368 = vmatprep.subr.bf16.mxu0 %v547_v0  ;;  %388 = vmatprep.subr.bf16.mxu1 %v547_v0 }
  0x64   :  { %369 = vmatpush3.bf16.msra.mxu0 %v417_v13  ;;  %389 = vmatpush3.bf16.msra.mxu1 %v418_v14 }
  0x65   :  { %370 = vmatprep.subr.bf16.mxu0 %v547_v0  ;;  %390 = vmatprep.subr.bf16.mxu1 %v547_v0 }
  0x68   :  { %371 = vmatpush3.bf16.msra.mxu0 %v419_v15  ;;  %391 = vmatpush3.bf16.msra.mxu1 %v420_v16 }
  0x6b   :  { %373 = vmatmul.mubr.bf16.vlgmr.msra.gmra.mrb[0].mxu0 %v103_v17  ;;  %393 = vmatmul.mubr.bf16.vlgmr.msra.gmra.mrb[0].mxu1 %v86_v18 }
 0x13e   :  { %v202_v19 = vpop.f32.mrb[0].mxu0  ;;  %v290_v21 = vpop.f32.mrb[0].mxu1 }
 0x13f   :  { %v374_v22 = vpop.f32.mrb[1].mxu0  ;;  %v291_v23 = vadd.f32 %v290_v21, %v202_v19  ;;  %v394_v24 = vpop.f32.mrb[1].mxu1 }
 0x140   :  { %v205_v25 = vpop.f32.mrb[2].mxu0  ;;  %v293_v26 = vpop.f32.mrb[2].mxu1 }
 0x141   :  { %v375_v27 = vpop.f32.mrb[3].mxu0  ;;  %v296_v28 = vadd.f32 %v321_v20, %v291_v23  ;;  %v395_v29 = vpop.f32.mrb[3].mxu1 }
 0x143   :  { %421 = vtanh.f32 %v296_v28 }
 0x14d   :  { %v422_v30 = vpop.eup %421 }
 0x14e   :  { %303 = vst [vmem:[#allocation11] sm:$0xff] %v422_v30 }
 0x14f   :  { %522 = shalt.err (!%p519_p8)
}
 0x150   :  { %s523_s19 = scalar_lea.hbm %s648_s5, 128 }
 0x151   :  { %p524_p9 = scmp.ne.s32.totalorder %s648_s5, %s523_s19  ;;  %p527_p10 = scmp.lt.u32.totalorder %s523_s19, %s648_s5 }
 0x153   :  { %p529_p11 = pnand %p527_p10, %p524_p9 }
 0x155   :  { %532 = shalt.err (!%p529_p11)
}
 0x156   :  { %313 = dma.vmem_to_hbm [thread:$0]  %s311_s16, 128, %s648_s5, [#allocation5]  }
 0x157   :  { %539 = dma.done.wait [#allocation5], 128  }
 0x158   :  { %540 = vsyncadd [#allocation5], 4294967168 }
 0x159   :  { %317 = vsyncpa [#allocation4], 1 }
 0x15a   :  { %318 = vsyncpa [#allocation7], 1 }
 0x15b   :  { %319 = vsyncpa [#allocation10], 1 }
 0x15c   :  { %320 = vsyncpa [#allocation5], 1 }

</bundles_post_ra>
